<compile_context>
chip_gen: v7x
topology: tpu7x:2x2x1
jax: 0.10.0
libtpu: 0.0.40
codegen_flags: <defaults>
</compile_context>

<pallas_src>
import functools

import jax
import jax.numpy as jnp
from jax import lax
from jax.experimental import pallas as pl
from jax.experimental.pallas import tpu as pltpu

_LANE = 128
_SUB = 8
_NEG_BIG = -1e30  # pad-lane bias: exp(-1e30 - m) == 0 in f32/bf16 logits


def _round_up(n, m):
    return ((n + m - 1) // m) * m


def _bucket_batch(b):
    """Bucket the batch dim to {8, 16, 32, ...} so variable per-step batch
    sizes map to a small, fixed set of compiled shapes."""
    b = _round_up(max(b, _SUB), _SUB)
    return 1 << (b - 1).bit_length()


def _vmem():
    return pl.BlockSpec(memory_space=pltpu.MemorySpace.VMEM)


def _smem():
    return pl.BlockSpec(memory_space=pltpu.MemorySpace.SMEM)


def _make_kernel(has_hidden: bool, with_labels: bool, want_lp: bool,
                 b_pad: int, c_pad: int):
    """Fused (linear->relu->) linear -> log_softmax (-> nll/argmax/acc)."""

    def kernel(*refs):
        refs = list(refs)
        x_ref = refs.pop(0)                    # [B_pad, In]
        if has_hidden:
            w1t_ref = refs.pop(0)              # [In, H]   (pre-transposed)
            b1_ref = refs.pop(0)               # [1, H]
        w2t_ref = refs.pop(0)                  # [H_or_In, Cpad]
        b2_ref = refs.pop(0)                   # [1, Cpad] (pad lanes = -1e30)
        if with_labels:
            y_ref = refs.pop(0)                # [B_pad, 1] int32 (pad rows = -1)
            invb_ref = refs.pop(0)             # [1] f32 in SMEM: 1 / true_batch
        lp_ref = refs.pop(0) if want_lp else None      # [B_pad, Cpad] f32
        stats_ref = refs.pop(0) if with_labels else None  # [B_pad, 128] f32

        h = x_ref[...]
        if has_hidden:
            # MXU matmul with f32 accumulate; no in-kernel transpose.
            h = jnp.dot(h, w1t_ref[...], preferred_element_type=jnp.float32)
            h = jnp.maximum(h + b1_ref[...], 0.0).astype(w2t_ref.dtype)

        logits = (jnp.dot(h, w2t_ref[...], preferred_element_type=jnp.float32)
                  + b2_ref[...])

        # Numerically stable log_softmax over the lane-dense class axis
        # (padded lanes carry -1e30 and are mathematically inert).
        m = jnp.max(logits, axis=1, keepdims=True)
        z = logits - m
        lse = jnp.log(jnp.sum(jnp.exp(z), axis=1, keepdims=True))
        log_probs = z - lse
        if want_lp:
            lp_ref[...] = log_probs.astype(lp_ref.dtype)

        if with_labels:
            y = y_ref[...]                                           # [B_pad, 1]
            cls = lax.broadcasted_iota(jnp.int32, (b_pad, c_pad), 1)
            onehot = cls == y                                        # [B_pad, Cpad]

            # F.nll_loss (mean): padded rows have y = -1 -> never match -> 0.
            # Denominator arrives as an SMEM scalar so the kernel does not
            # bake the true batch size.
            # TODO(synk): labels outside [0, C) / ignore_index silently add 0
            # instead of erroring like F.nll_loss.
            picked = jnp.sum(jnp.where(onehot, log_probs, 0.0),
                             axis=1, keepdims=True)                  # [B_pad, 1]
            loss = -jnp.sum(picked, axis=0, keepdims=True) * invb_ref[0]  # [1,1]

            # argmax over classes, first-max tie-break (matches torch .max(1)).
            is_max = logits == m
            pred = jnp.min(jnp.where(is_max, cls, c_pad),
                           axis=1, keepdims=True)                    # [B_pad, 1]
            acc = (pred == y).astype(jnp.float32)                    # [B_pad, 1]

            # One lane-dense store for all label stats:
            #   lane 0 = loss (broadcast), lane 1 = pred, lane 2 = acc.
            lane = lax.broadcasted_iota(jnp.int32, (b_pad, _LANE), 1)
            stats = jnp.where(
                lane == 0, loss,
                jnp.where(lane == 1, pred.astype(jnp.float32),
                          jnp.where(lane == 2, acc, 0.0)))
            stats_ref[...] = stats

    return kernel


def _run_pallas(x, w1t, b1, w2t, b2p, y, inv_b, *, want_lp: bool):
    has_hidden = w1t is not None
    with_labels = y is not None
    b_pad = x.shape[0]
    c_pad = w2t.shape[1]

    inputs, in_specs = [x], [_vmem()]
    if has_hidden:
        inputs += [w1t, b1]
        in_specs += [_vmem(), _vmem()]
    inputs += [w2t, b2p]
    in_specs += [_vmem(), _vmem()]
    if with_labels:
        inputs += [y, inv_b]
        in_specs += [_vmem(), _smem()]

    out_shape, out_specs = [], []
    if want_lp:
        out_shape.append(jax.ShapeDtypeStruct((b_pad, c_pad), jnp.float32))
        out_specs.append(_vmem())
    if with_labels:
        out_shape.append(jax.ShapeDtypeStruct((b_pad, _LANE), jnp.float32))
        out_specs.append(_vmem())

    # Single full-array block: at these shapes everything is VMEM-resident.
    return pl.pallas_call(
        _make_kernel(has_hidden, with_labels, want_lp, b_pad, c_pad),
        out_shape=out_shape,
        in_specs=in_specs,
        out_specs=out_specs,
    )(*inputs)


@functools.partial(jax.jit, static_argnames=("num_class", "batch"))
def _forward_infer(x, w1t, b1, w2t, b2p, *, num_class, batch):
    b_pad = _bucket_batch(batch)
    xf = jnp.asarray(x, w2t.dtype)
    x_pad = jnp.pad(xf, ((0, b_pad - batch), (0, 0)))
    lp = _run_pallas(x_pad, w1t, b1, w2t, b2p, None, None, want_lp=True)[0]
    return lp[:batch, :num_class]


@functools.partial(jax.jit,
                   static_argnames=("num_class", "batch", "want_log_probs"))
def _forward_train(x, y, w1t, b1, w2t, b2p, *, num_class, batch,
                   want_log_probs):
    b_pad = _bucket_batch(batch)
    xf = jnp.asarray(x, w2t.dtype)
    x_pad = jnp.pad(xf, ((0, b_pad - batch), (0, 0)))
    y_i = jnp.asarray(y, jnp.int32).reshape(batch, 1)
    y_pad = jnp.pad(y_i, ((0, b_pad - batch), (0, 0)), constant_values=-1)
    inv_b = jnp.full((1,), 1.0 / batch, jnp.float32)   # SMEM scalar denominator

    outs = _run_pallas(x_pad, w1t, b1, w2t, b2p, y_pad, inv_b,
                       want_lp=want_log_probs)
    if want_log_probs:
        lp = outs[0][:batch, :num_class]
        stats = outs[1]
    else:
        lp = None
        stats = outs[0]
    loss = stats[0, 0]
    acc = stats[:batch, 2:3] > 0.5          # [B, 1] bool, mirrors torch acc
    return lp, loss, acc


def prepare_mlp_params(w1, b1, w2, b2, compute_dtype=jnp.float32):
    """One-time, per-model parameter prep (keep OUT of the per-step hot path):
      * weights transposed to [in, out] so the kernel issues plain jnp.dot,
      * class axis padded to a multiple of 128 lanes (pad bias = -1e30 so the
        padded lanes never affect max / exp-sum / argmax),
      * optional bf16 matmul operands (recommended on v6e/v7x at larger sizes).
    w1 may be None for the hidden_size == 0 path. PyTorch Linear layout:
    w* is [out, in], b* is [out] (or [1, out])."""
    num_class, in_dim = w2.shape
    c_pad = _round_up(num_class, _LANE)

    w2t = jnp.zeros((in_dim, c_pad), compute_dtype)
    w2t = w2t.at[:, :num_class].set(jnp.asarray(w2, compute_dtype).T)
    b2p = jnp.full((1, c_pad), _NEG_BIG, jnp.float32)
    b2p = b2p.at[:, :num_class].set(
        jnp.asarray(b2, jnp.float32).reshape(1, num_class))

    params = {"w1t": None, "b1": None, "w2t": w2t, "b2p": b2p,
              "num_class": num_class}
    if w1 is not None:
        params["w1t"] = jnp.asarray(w1, compute_dtype).T
        params["b1"] = jnp.asarray(b1, jnp.float32).reshape(1, -1)
    return params


def mlp_classifier_forward(params, x, y=None, want_log_probs=True):
    """Fused MLPClassifier forward.

    params: dict from prepare_mlp_params (one-time prep).
    x:      [B, In] float
    y:      optional [B] int labels

    Returns log_probs [B, C]; with labels returns (log_probs, loss, acc) with
    acc a [B, 1] bool array, mirroring the PyTorch module. Pass
    want_log_probs=False to skip the log-prob writeback (loss/acc only)."""
    B = x.shape[0]
    C = params["num_class"]
    if y is None:
        return _forward_infer(x, params["w1t"], params["b1"],
                              params["w2t"], params["b2p"],
                              num_class=C, batch=B)
    lp, loss, acc = _forward_train(x, y, params["w1t"], params["b1"],
                                   params["w2t"], params["b2p"],
                                   num_class=C, batch=B,
                                   want_log_probs=want_log_probs)
    if want_log_probs:
        return lp, loss, acc
    return loss, acc


if __name__ == "__main__":
    # Small shapes consistent with MLPClassifier(input_size, hidden_size, num_class)
    B, INPUT_SIZE, HIDDEN_SIZE, NUM_CLASS = 8, 32, 32, 16

    key = jax.random.PRNGKey(0)
    kx, k1, k2, k3, k4, k5, k6, ky = jax.random.split(key, 8)

    x = jax.random.normal(kx, (B, INPUT_SIZE), dtype=jnp.float32)

    # PyTorch Linear layout: weight [out, in], bias [out]
    w1 = jax.random.normal(k1, (HIDDEN_SIZE, INPUT_SIZE), dtype=jnp.float32) * 0.1
    b1 = jax.random.normal(k2, (1, HIDDEN_SIZE), dtype=jnp.float32) * 0.1
    w2 = jax.random.normal(k3, (NUM_CLASS, HIDDEN_SIZE), dtype=jnp.float32) * 0.1
    b2 = jax.random.normal(k4, (1, NUM_CLASS), dtype=jnp.float32) * 0.1
    y = jax.random.randint(ky, (B,), 0, NUM_CLASS)

    params = prepare_mlp_params(w1, b1, w2, b2)          # one-time prep

    # ---- hidden_size > 0, no labels ----
    log_probs = jax.block_until_ready(mlp_classifier_forward(params, x))
    ref_h = jnp.maximum(x @ w1.T + b1, 0.0)
    ref_lp = jax.nn.log_softmax(ref_h @ w2.T + b2, axis=1)
    assert log_probs.shape == (B, NUM_CLASS)
    assert jnp.allclose(log_probs, ref_lp, atol=1e-5, rtol=1e-5)
    assert jnp.allclose(jnp.sum(jnp.exp(log_probs), axis=1), 1.0, atol=1e-5)

    # ---- hidden_size > 0, with labels (fused loss / pred / acc) ----
    lp, loss, acc = mlp_classifier_forward(params, x, y=y)
    jax.block_until_ready((lp, loss, acc))
    ref_loss = -jnp.mean(ref_lp[jnp.arange(B), y])
    ref_acc = jnp.argmax(ref_lp, axis=1) == y
    assert jnp.allclose(lp, ref_lp, atol=1e-5, rtol=1e-5)
    assert jnp.allclose(loss, ref_loss, atol=1e-5, rtol=1e-5)
    assert acc.shape == (B, 1) and acc.dtype == jnp.bool_
    assert bool(jnp.all(acc[:, 0] == ref_acc))

    # ---- loss/acc only (skips the log_prob writeback) ----
    loss2, acc2 = mlp_classifier_forward(params, x, y=y, want_log_probs=False)
    jax.block_until_ready((loss2, acc2))
    assert jnp.allclose(loss2, ref_loss, atol=1e-5, rtol=1e-5)
    assert bool(jnp.all(acc2[:, 0] == ref_acc))

    # ---- ragged batch (exercises batch bucketing / padding; B=6 -> bucket 8) ----
    Br = 6
    lp_r, loss_r, acc_r = mlp_classifier_forward(params, x[:Br], y=y[:Br])
    jax.block_until_ready((lp_r, loss_r, acc_r))
    ref_lp_r = ref_lp[:Br]
    ref_loss_r = -jnp.mean(ref_lp_r[jnp.arange(Br), y[:Br]])
    assert lp_r.shape == (Br, NUM_CLASS)
    assert jnp.allclose(lp_r, ref_lp_r, atol=1e-5, rtol=1e-5)
    assert jnp.allclose(loss_r, ref_loss_r, atol=1e-5, rtol=1e-5)

    # ---- hidden_size == 0 path (last_weights applied directly to x) ----
    w2_nh = jax.random.normal(k5, (NUM_CLASS, INPUT_SIZE), dtype=jnp.float32) * 0.1
    b2_nh = jax.random.normal(k6, (1, NUM_CLASS), dtype=jnp.float32) * 0.1
    params_nh = prepare_mlp_params(None, None, w2_nh, b2_nh)
    lp_nh = jax.block_until_ready(mlp_classifier_forward(params_nh, x))
    ref_lp_nh = jax.nn.log_softmax(x @ w2_nh.T + b2_nh, axis=1)
    assert jnp.allclose(lp_nh, ref_lp_nh, atol=1e-5, rtol=1e-5)

    print("KERNEL_OK")
</pallas_src>

<mosaic_0001>
module attributes {stable_mosaic.version = 11 : i64} {
  func.func @kernel(%arg0: memref<8x32xf32, #tpu.memory_space<vmem>>, %arg1: memref<32x32xf32, #tpu.memory_space<vmem>>, %arg2: memref<1x32xf32, #tpu.memory_space<vmem>>, %arg3: memref<32x128xf32, #tpu.memory_space<vmem>>, %arg4: memref<1x128xf32, #tpu.memory_space<vmem>>, %arg5: memref<8x128xf32, #tpu.memory_space<vmem>>) attributes {dimension_semantics = [], scalar_prefetch = 0 : i64, scratch_operands = 0 : i64, tpu.core_type = #tpu.core_type<tc>} {
    %c0 = arith.constant 0 : index
    %c0_0 = arith.constant 0 : index
    %0 = vector.load %arg0[%c0, %c0_0] : memref<8x32xf32, #tpu.memory_space<vmem>>, vector<8x32xf32>
    %c0_1 = arith.constant 0 : index
    %c0_2 = arith.constant 0 : index
    %1 = vector.load %arg1[%c0_1, %c0_2] : memref<32x32xf32, #tpu.memory_space<vmem>>, vector<32x32xf32>
    %cst = arith.constant dense<0.000000e+00> : vector<8x32xf32>
    %2 = tpu.matmul %0, %1, %cst {dimension_numbers = #tpu.dot_dimension_numbers<[1], [0], [0], [1], [0, 0, 1, 1], [], []>} : vector<8x32xf32>, vector<32x32xf32>, vector<8x32xf32> -> vector<8x32xf32>
    %c0_3 = arith.constant 0 : index
    %c0_4 = arith.constant 0 : index
    %3 = vector.load %arg2[%c0_3, %c0_4] : memref<1x32xf32, #tpu.memory_space<vmem>>, vector<1x32xf32>
    %4 = vector.broadcast %3 : vector<1x32xf32> to vector<8x32xf32>
    %5 = arith.addf %2, %4 : vector<8x32xf32>
    %cst_5 = arith.constant 0.000000e+00 : f32
    %6 = vector.broadcast %cst_5 : f32 to vector<8x32xf32>
    %7 = arith.maximumf %5, %6 : vector<8x32xf32>
    %c0_6 = arith.constant 0 : index
    %c0_7 = arith.constant 0 : index
    %8 = vector.load %arg3[%c0_6, %c0_7] : memref<32x128xf32, #tpu.memory_space<vmem>>, vector<32x128xf32>
    %cst_8 = arith.constant dense<0.000000e+00> : vector<8x128xf32>
    %9 = tpu.matmul %7, %8, %cst_8 {dimension_numbers = #tpu.dot_dimension_numbers<[1], [0], [0], [1], [0, 0, 1, 1], [], []>} : vector<8x32xf32>, vector<32x128xf32>, vector<8x128xf32> -> vector<8x128xf32>
    %c0_9 = arith.constant 0 : index
    %c0_10 = arith.constant 0 : index
    %10 = vector.load %arg4[%c0_9, %c0_10] : memref<1x128xf32, #tpu.memory_space<vmem>>, vector<1x128xf32>
    %11 = vector.broadcast %10 : vector<1x128xf32> to vector<8x128xf32>
    %12 = arith.addf %9, %11 : vector<8x128xf32>
    %cst_11 = arith.constant dense<0xFF800000> : vector<8xf32>
    %13 = vector.multi_reduction <maximumf>, %12, %cst_11 [1] : vector<8x128xf32> to vector<8xf32>
    %14 = vector.shape_cast %13 : vector<8xf32> to vector<8x1xf32>
    %15 = vector.broadcast %14 : vector<8x1xf32> to vector<8x128xf32>
    %16 = arith.subf %12, %15 : vector<8x128xf32>
    %17 = math.exp %16 : vector<8x128xf32>
    %cst_12 = arith.constant dense<0.000000e+00> : vector<8xf32>
    %18 = vector.multi_reduction <add>, %17, %cst_12 [1] : vector<8x128xf32> to vector<8xf32>
    %19 = vector.shape_cast %18 : vector<8xf32> to vector<8x1xf32>
    %20 = math.log %19 : vector<8x1xf32>
    %21 = vector.broadcast %20 : vector<8x1xf32> to vector<8x128xf32>
    %22 = arith.subf %16, %21 : vector<8x128xf32>
    %c0_13 = arith.constant 0 : index
    %c0_14 = arith.constant 0 : index
    %23 = vector.load %arg5[%c0_13, %c0_14] : memref<8x128xf32, #tpu.memory_space<vmem>>, vector<8x128xf32>
    tpu.vector_store %arg5[%c0_13, %c0_14], %22 {strides = array<i32>} : memref<8x128xf32, #tpu.memory_space<vmem>>, vector<8x128xf32>,
    return
  }
}

</mosaic_0001>

<bundles_post_ra>
// kernel: _forward_infer.1
= control target key start
LH: loop header
LB: loop body
LE: loop exit
PB: predicated region body
PF: predicated region fallthrough
CT: control target
= control target key end

     0   :  { %10 = vsyncpa [#allocation3], 0  ;;  %s512_s0 = inlined_call_operand.hbm [shape: f32[8,32], index: 0, kind: input, shape index: {}]   ;;  %s513_s1 = inlined_call_operand.hbm [shape: f32[32,32], index: 1, kind: input, shape index: {}]   ;;  %s514_s2 = inlined_call_operand.vmem [shape: f32[1,32], index: 2, kind: input, shape index: {}]   ;;  %s515_s3 = inlined_call_operand.hbm [shape: f32[32,128], index: 3, kind: input, shape index: {}]   ;;  %s516_s4 = inlined_call_operand.vmem [shape: f32[1,128], index: 4, kind: input, shape index: {}]   ;;  %s517_s5 = inlined_call_operand.hbm [shape: f32[8,128], index: 5, kind: output, shape index: {}]  }
   0x1   :  { %11 = vsyncpa [#allocation6], 0 }
   0x2   :  { %12 = vsyncpa [#allocation4], 0  ;;  %s413_s18 = smov [#allocation5]   ;;  %s319_s22 = scalar_lea.hbm %s513_s1, 512 }
   0x3   :  { %s28_s19 = sshll.u32 %s413_s18, 4  ;;  %p320_p0 = scmp.ne.s32.totalorder %s513_s1, %s319_s22  ;;  %s29_s19 = int_to_ptr.vmem [resolvable:$true] %s28_s19 }
   0x4   :  { %p323_p1 = scmp.lt.u32.totalorder %s319_s22, %s513_s1 }
   0x6   :  { %p325_p2 = pnand %p323_p1, %p320_p0 }
   0x8   :  { %328 = shalt.err (!%p325_p2)
}
   0x9   :  { %s329_s27 = scalar_lea.vmem %s29_s19, 512  ;;  %p334_p4 = scmp.lt.s32.totalorder %s29_s19, %s29_s19 }
   0xa   :  { %p330_p3 = scmp.ne.s32.totalorder %s29_s19, %s329_s27  ;;  %p335_p5 = scmp.lt.s32.totalorder %s329_s27, %s329_s27 }
   0xc   :  { %p336_p6 = por %p335_p5, %p334_p4 }
   0xe   :  { %p337_p7 = pnand %p336_p6, %p330_p3 }
  0x10   :  { %340 = shalt.err (!%p337_p7)
}
  0x11   :  { %s414_s28 = smov 128   ;;  %s415_s29 = smov 8  }
  0x12   :  { %34 = dma.hbm_to_vmem [thread:$0]  %s513_s1, 512, %s29_s19, [#allocation6], %s414_s28, %s414_s28, %s415_s29  }
  0x13   :  { %s416_s7 = smov [#allocation2]   ;;  %s417_s9 = smov [#allocation7]  }
  0x14   :  { %s19_s8 = sshll.u32 %s416_s7, 4  ;;  %s42_s10 = sshll.u32 %s417_s9, 4  ;;  %s20_s8 = int_to_ptr.vmem [resolvable:$true] %s19_s8  ;;  %s43_s10 = int_to_ptr.vmem [resolvable:$true] %s42_s10 }
  0x15   :  { %s341_s13 = scalar_lea.hbm %s512_s0, 128 }
  0x16   :  { %p342_p8 = scmp.ne.s32.totalorder %s512_s0, %s341_s13  ;;  %p345_p9 = scmp.lt.u32.totalorder %s341_s13, %s512_s0 }
  0x18   :  { %p347_p10 = pnand %p345_p9, %p342_p8 }
  0x1a   :  { %350 = shalt.err (!%p347_p10)
}
  0x1b   :  { %s351_s1 = scalar_lea.vmem %s20_s8, 128  ;;  %p356_p12 = scmp.lt.s32.totalorder %s20_s8, %s20_s8 }
  0x1c   :  { %p352_p11 = scmp.ne.s32.totalorder %s20_s8, %s351_s1  ;;  %p357_p13 = scmp.lt.s32.totalorder %s351_s1, %s351_s1 }
  0x1e   :  { %p358_p0 = por %p357_p13, %p356_p12 }
  0x20   :  { %p359_p1 = pnand %p358_p0, %p352_p11 }
  0x22   :  { %362 = shalt.err (!%p359_p1)
}
  0x23   :  { %22 = dma.hbm_to_vmem [thread:$0]  %s512_s0, 128, %s20_s8, [#allocation3]  }
  0x24   :  { %s363_s22 = scalar_lea.hbm %s515_s3, 512 }
  0x25   :  { %p364_p2 = scmp.ne.s32.totalorder %s515_s3, %s363_s22  ;;  %p367_p3 = scmp.lt.u32.totalorder %s363_s22, %s515_s3 }
  0x27   :  { %p369_p4 = pnand %p367_p3, %p364_p2 }
  0x29   :  { %372 = shalt.err (!%p369_p4)
}
  0x2a   :  { %s373_s27 = scalar_lea.vmem %s43_s10, 512  ;;  %p378_p6 = scmp.lt.s32.totalorder %s43_s10, %s43_s10 }
  0x2b   :  { %p374_p5 = scmp.ne.s32.totalorder %s43_s10, %s373_s27  ;;  %p379_p7 = scmp.lt.s32.totalorder %s373_s27, %s373_s27 }
  0x2d   :  { %p380_p8 = por %p379_p7, %p378_p6 }
  0x2f   :  { %p381_p9 = pnand %p380_p8, %p374_p5 }
  0x31   :  { %384 = shalt.err (!%p381_p9)
}
  0x32   :  { %48 = dma.hbm_to_vmem [thread:$0]  %s515_s3, 512, %s43_s10, [#allocation6], %s414_s28, %s414_s28, %s415_s29  }
  0x33   :  { %407 = dma.done.wait [#allocation3], 128  }
  0x34   :  { %408 = vsyncadd [#allocation3], 4294967168 }
  0x35   :  { %409 = dma.done.wait [#allocation6], 1024  }
  0x36   :  { %410 = vsyncadd [#allocation6], 4294966272  ;;  %v418_v0 = vmov 0.0|0.0   ;;  %vm419_vm0 = vmmov 0   ;;  %v420_v1 = vmov 0.0   ;;  %v61_v2 = vld [vmem:[#allocation5] sm:$0xff] }
  0x37   :  { %294 = vmatprep.subr.bf16.mxu0 %v418_v0  ;;  %280 = vmatprep.mubr.msk.f32.mxu0 %vm419_vm0, %v420_v1  ;;  %v62_v3 = vld [vmem:[#allocation5 + $0x8] sm:$0xff]  ;;  %v63_v4 = vld [vmem:[#allocation5 + $0x10] sm:$0xff]  ;;  %v64_v6 = vld [vmem:[#allocation5 + $0x18] sm:$0xff]  ;;  %vm72_vm1 = vcmask 261120  }
  0x38   :  { %300 = vmatprep.subr.bf16.mxu1 %v418_v0  ;;  %291 = vmatprep.mubr.msk.f32.mxu1 %vm419_vm0, %v420_v1  ;;  %v295_v5 = vpack.c.bf16 %v62_v3, %v61_v2  ;;  %v147_v7 = vld [vmem:[#allocation7] sm:$0xff]  ;;  %v148_v8 = vld [vmem:[#allocation7 + $0x8] sm:$0xff]  ;;  %v298_v9 = vpack.c.bf16 %v64_v6, %v63_v4  ;;  %v60_v11 = vld [vmem:[#allocation2] sm:$0xff] }
  0x39   :  { %v301_v10 = vpack.c.bf16 %v148_v8, %v147_v7  ;;  %v149_v12 = vld [vmem:[#allocation7 + $0x10] sm:$0xff]  ;;  %v150_v13 = vld [vmem:[#allocation7 + $0x18] sm:$0xff] }
  0x3a   :  { %296 = vmatpush3.bf16.msra.mxu0 %v295_v5  ;;  %v304_v14 = vpack.c.bf16 %v150_v13, %v149_v12  ;;  %v258_v15 = vld [vmem:[%s514_s2] ss:$0 sm:$0xff]  ;;  %s421_s2 = smov [#allocation8]  }
  0x3b   :  { %297 = vmatprep.subr.bf16.mxu0 %v418_v0  ;;  %302 = vmatpush3.bf16.msra.mxu1 %v301_v10  ;;  %v260_v20 = vld [vmem:[%s516_s4] ss:$0 sm:$0xff]  ;;  %s248_s7 = sshll.u32 %s421_s2, 4  ;;  %s249_s7 = int_to_ptr.vmem [resolvable:$true] %s248_s7 }
  0x3c   :  { %303 = vmatprep.subr.bf16.mxu1 %v418_v0  ;;  %s385_s4 = scalar_lea.vmem %s249_s7, 128  ;;  %p390_p11 = scmp.lt.s32.totalorder %s249_s7, %s249_s7 }
  0x3d   :  { %p386_p10 = scmp.ne.s32.totalorder %s249_s7, %s385_s4  ;;  %p391_p12 = scmp.lt.s32.totalorder %s385_s4, %s385_s4 }
  0x3e   :  { %299 = vmatpush3.bf16.msra.mxu0 %v298_v9 }
  0x3f   :  { %305 = vmatpush3.bf16.msra.mxu1 %v304_v14  ;;  %p392_p13 = por %p391_p12, %p390_p11 }
  0x41   :  { %281 = vmatmul.mubr.msk.f32.vlgmr.msra.gmra.mrb[0].mxu0 %vm72_vm1, %v60_v11  ;;  %p393_p0 = pnand %p392_p13, %p386_p10 }
 0x114   :  { %v142_v16 = vpop.f32.mrb[0].mxu0 }
 0x115   :  { %v143_v17 = vadd.f32 %v258_v15, %v142_v16  ;;  %v282_v18 = vpop.f32.mrb[1].mxu0 }
 0x117   :  { %v146_v19 = vmax.f32 %v143_v17, 0.0 }
 0x119   :  { %292 = vmatmul.mubr.msk.f32.vlgmr.msra.gmra.mrb[0].mxu1 %vm72_vm1, %v146_v19 }
 0x1ec   :  { %v227_v21 = vpop.f32.mrb[0].mxu1 }
 0x1ed   :  { %v228_v22 = vadd.f32 %v260_v20, %v227_v21  ;;  %v293_v23 = vpop.f32.mrb[1].mxu1 }
 0x1ef   :  { %231 = vmax.xlane.f32.xlu0 %v228_v22 }
 0x27c   :  { %v232_v24 = vpop.xlane.xlu0 %231 }
 0x27d   :  { %v233_v25 = vsub.f32 %v228_v22, %v232_v24 }
 0x27f   :  { %v234_v26 = vmul.f32 1.442695, %v233_v25 }
 0x281   :  { %315 = vpow2.f32 %v234_v26 }
 0x28b   :  { %v316_v27 = vpop.eup %315 }
 0x28c   :  { %236 = vadd.xlane.f32.xlu0 %v316_v27 }
 0x319   :  { %v237_v28 = vpop.xlane.xlu0 %236 }
 0x31a   :  { %317 = vlog2.f32 %v237_v28 }
 0x324   :  { %v318_v29 = vpop.eup %317 }
 0x325   :  { %v239_v30 = vmul.f32 0.6931472, %v318_v29 }
 0x327   :  { %v240_v31 = vsub.f32 %v233_v25, %v239_v30 }
 0x329   :  { %241 = vst [vmem:[#allocation8] sm:$0xff] %v240_v31 }
 0x32a   :  { %396 = shalt.err (!%p393_p0)
}
 0x32b   :  { %s397_s10 = scalar_lea.hbm %s517_s5, 128 }
 0x32c   :  { %p398_p1 = scmp.ne.s32.totalorder %s517_s5, %s397_s10  ;;  %p401_p2 = scmp.lt.u32.totalorder %s397_s10, %s517_s5 }
 0x32e   :  { %p403_p3 = pnand %p401_p2, %p398_p1 }
 0x330   :  { %406 = shalt.err (!%p403_p3)
}
 0x331   :  { %251 = dma.vmem_to_hbm [thread:$0]  %s249_s7, 128, %s517_s5, [#allocation4]  }
 0x332   :  { %411 = dma.done.wait [#allocation4], 128  }
 0x333   :  { %412 = vsyncadd [#allocation4], 4294967168 }
 0x334   :  { %255 = vsyncpa [#allocation3], 1 }
 0x335   :  { %256 = vsyncpa [#allocation6], 1 }
 0x336   :  { %257 = vsyncpa [#allocation4], 1 }

</bundles_post_ra>
